<compile_context>
chip_gen: v7x
topology: tpu7x:2x2x1
jax: 0.10.0
libtpu: 0.0.40
codegen_flags: <defaults>
</compile_context>

<pallas_src>
import functools

import jax
import jax.numpy as jnp
import numpy as np
from jax import lax
from jax.experimental import pallas as pl
from jax.experimental.pallas import tpu as pltpu


def _round_up(x, m):
    return (x + m - 1) // m * m


def _rdf_hist_kernel(scal_ref, xyz_i_ref, xyz_j_ref, soffb_ref, out_ref, acc_ref,
                     *, n_real, slab, skip_empty_tiles):
    """Gaussian-smeared pair-distance histogram for one i-tile vs ALL atoms.

    Coordinates / cell / cutoff arrive pre-scaled by s = sqrt(-coeff) so that
    exp(coeff*(d-o)^2) == exp(-(s*d - s*o)^2): the (uniform) Gaussian coefficient
    is folded into the geometry and no per-element multiply by coeff is needed.
    """
    i = pl.program_id(0)
    tile_i = xyz_i_ref.shape[0]
    num_j = xyz_j_ref.shape[0]
    tile_j = xyz_j_ref.shape[2]
    n_slabs = tile_i // slab

    # scaled-geometry scalars (SMEM): cell diag, 1/cell, cutoff^2, sentinel dist
    cx, cy, cz = scal_ref[0], scal_ref[1], scal_ref[2]
    icx, icy, icz = scal_ref[3], scal_ref[4], scal_ref[5]
    cutoff_sq = scal_ref[6]
    sentinel = scal_ref[7]

    soff_b = soffb_ref[...]                          # (nbins, tile_j) scaled centers
    acc_ref[...] = jnp.zeros_like(acc_ref)           # scratch persists: re-zero per i

    # hoisted iotas for padding masks (tiny per-slab compares, no 2-D iota per tile)
    col_iota = lax.broadcasted_iota(jnp.int32, (1, tile_j), 1)
    row_iota = lax.broadcasted_iota(jnp.int32, (slab, 1), 0)
    row_base = i * tile_i

    def j_body(jc, carry):
        xyz_j = xyz_j_ref[jc]                        # (3, tile_j) scaled column chunk
        xj = xyz_j[0:1, :]
        yj = xyz_j[1:2, :]
        zj = xyz_j[2:3, :]
        col_ok = (col_iota + jc * tile_j) < n_real   # (1, tile_j)

        def s_body(s, carry2):
            row0 = pl.multiple_of(s * slab, slab)
            ri = xyz_i_ref[pl.ds(row0, slab), :]      # (slab, 3) scaled row coords
            row_ok = (row_iota + (row_base + row0)) < n_real   # (slab, 1)

            # minimum-image displacement (scaled); floor(x + 0.5) reproduces the
            # reference's single +-cell shift exactly for in-cell displacements.
            dx = xj - ri[:, 0:1]
            dx = dx - cx * jnp.floor(dx * icx + 0.5)
            dy = yj - ri[:, 1:2]
            dy = dy - cy * jnp.floor(dy * icy + 0.5)
            dz = zj - ri[:, 2:3]
            dz = dz - cz * jnp.floor(dz * icz + 0.5)
            dsq = dx * dx + dy * dy + dz * dz         # (slab, tile_j)

            valid = (dsq < cutoff_sq) & (dsq != 0.0) & col_ok & row_ok
            # sentinel distance: (sentinel - soff)^2 >= 32^2 -> exp underflows to
            # exactly 0, so excluded pairs need no 3-D select.
            sd = jnp.where(valid, jnp.sqrt(dsq), sentinel)

            def _smear():
                contrib = acc_ref[...]                # (nbins, tile_j)
                for r in range(slab):                 # static unroll over slab rows
                    diff = sd[r:r + 1, :] - soff_b    # (nbins, tile_j) lane-dense
                    contrib = contrib + jnp.exp(-(diff * diff))
                acc_ref[...] = contrib

            if skip_empty_tiles:
                # tile-level early-out for sparse-cutoff workloads
                pl.when(jnp.sum(valid.astype(jnp.float32)) > 0.0)(_smear)
            else:
                _smear()
            return carry2

        return lax.fori_loop(0, n_slabs, s_body, carry)

    lax.fori_loop(0, num_j, j_body, 0)
    out_ref[0] = acc_ref[...]                         # single lane-dense write per i
    # TODO(synk): EUP-count reduction (per-bin-block geometric exp recurrence, or a
    # bf16 one-hot x Gaussian-table MXU matmul) needs numerical validation; skipped.


def rdf_pallas(xyz, cell, offsets, coeff, vol_bins, V, cutoff, *,
               tile_i=256, slab=8, skip_empty_tiles=False):
    """Pallas rdf forward: returns (count, rdf) matching the PyTorch module."""
    N = xyz.shape[0]
    nbins = offsets.shape[0]
    tile_j = 128                                      # keep the lane axis at 128

    xyz = xyz.astype(jnp.float32)
    cell = cell.astype(jnp.float32)
    offsets = offsets.astype(jnp.float32)
    coeff = jnp.asarray(coeff, jnp.float32)
    vol_bins = jnp.asarray(vol_bins, jnp.float32)

    # Fold the Gaussian coefficient into the geometry.
    # NOTE: assumes a single (uniform, non-trainable) smearing width, i.e. the
    # module's GaussianSmearing(width=None, trainable=False) configuration.
    s = jnp.sqrt(-coeff.reshape(-1)[0])
    xyz_s = xyz * s
    cell_s = cell * s
    soff = offsets * s                                # (nbins,) scaled centers
    cutoff_sq_s = (s * jnp.float32(cutoff)) ** 2
    sentinel = jnp.max(soff) + 32.0                   # exp(-(32)^2) == 0 in f32
    scalars = jnp.concatenate([cell_s, 1.0 / cell_s,
                               cutoff_sq_s.reshape(1), sentinel.reshape(1)])  # (8,)

    # i tiling: multiple of the slab; keep num_i >= 2 for small N so the
    # "parallel" grid axis can feed both TensorCores on dual-core parts (v7x).
    tile_i = max(slab, min(int(tile_i), _round_up(-(-N // 2), slab)))
    tile_i = _round_up(tile_i, slab)
    n_pad_i = _round_up(N, tile_i)
    num_i = n_pad_i // tile_i

    # j axis: fully VMEM-resident as (num_j, 3, tile_j), looped over in-kernel
    # (12*N bytes -> fits VMEM comfortably for N up to ~1e6).
    n_pad_j = _round_up(N, tile_j)
    num_j = n_pad_j // tile_j

    xyz_rows = jnp.pad(xyz_s, ((0, n_pad_i - N), (0, 0)))             # (n_pad_i, 3)
    xyz_cols = jnp.pad(xyz_s.T, ((0, 0), (0, n_pad_j - N)))           # (3, n_pad_j)
    xyz_cols = xyz_cols.reshape(3, num_j, tile_j).transpose(1, 0, 2)  # (num_j,3,tile_j)

    soff_b = jnp.broadcast_to(soff[:, None], (nbins, tile_j))         # hoisted bcast

    kernel = functools.partial(_rdf_hist_kernel, n_real=N, slab=slab,
                               skip_empty_tiles=skip_empty_tiles)

    partials = pl.pallas_call(
        kernel,
        out_shape=jax.ShapeDtypeStruct((num_i, nbins, tile_j), jnp.float32),
        grid=(num_i,),
        in_specs=[
            pl.BlockSpec(memory_space=pltpu.MemorySpace.SMEM),        # scaled scalars
            pl.BlockSpec((tile_i, 3), lambda i: (i, 0)),              # xyz row tile
            pl.BlockSpec((num_j, 3, tile_j), lambda i: (0, 0, 0)),    # resident columns
            pl.BlockSpec((nbins, tile_j), lambda i: (0, 0)),          # gaussian centers
        ],
        out_specs=pl.BlockSpec((1, nbins, tile_j), lambda i: (i, 0, 0)),
        scratch_shapes=[pltpu.VMEM((nbins, tile_j), jnp.float32)],
        compiler_params=pltpu.CompilerParams(
            dimension_semantics=("parallel",)),
        cost_estimate=pl.CostEstimate(
            flops=5 * n_pad_i * n_pad_j * nbins,
            transcendentals=n_pad_i * n_pad_j * (nbins + 1),
            bytes_accessed=(n_pad_i * 3 * 4 + n_pad_j * 3 * 4
                            + nbins * tile_j * 4 + num_i * nbins * tile_j * 4)),
    )(scalars, xyz_rows, xyz_cols, soff_b)

    # tiny nbins-sized epilogue in plain JAX: lane reduce, normalize, volume shells
    count_raw = jnp.sum(partials, axis=(0, 2))                        # (nbins,)
    total = jnp.sum(count_raw)
    count = count_raw / jnp.where(total > 0.0, total, 1.0)            # NaN guard
    g_r = count / (vol_bins / jnp.float32(V))
    return count, g_r


def rdf_reference(xyz, cell, offsets, coeff, vol_bins, V, cutoff):
    """Pure-JAX mirror of the PyTorch forward (for correctness check)."""
    dis_mat = xyz[None, :, :] - xyz[:, None, :]
    shift = (-(dis_mat >= 0.5 * cell).astype(jnp.float32)
             + (dis_mat < -0.5 * cell).astype(jnp.float32))
    dis_mat = dis_mat + shift * cell
    dsq = (dis_mat ** 2).sum(-1)
    mask = jnp.logical_and(dsq < cutoff ** 2, dsq != 0.0)
    dist = jnp.sqrt(dsq)
    diff = dist[:, :, None] - offsets
    gauss = jnp.exp(coeff * diff * diff) * mask[:, :, None].astype(jnp.float32)
    count = gauss.sum((0, 1))
    count = count / count.sum()
    return count, count / (vol_bins / V)


if __name__ == "__main__":
    # --- deterministic module configuration (mirrors rdf.__init__) ---
    nbins = 64
    start, end = 0.25, 3.0        # r_range
    N = 250                       # number of atoms (exercises row/col padding paths)
    L = 3.0                       # cubic box side -> cell diag

    bins = jnp.linspace(start, end, nbins + 1).astype(jnp.float32)
    vol_bins = (4.0 * np.pi / 3.0) * (bins[1:] ** 3 - bins[:-1] ** 3)
    V = 4.0 / 3.0 * np.pi * end ** 3
    cutoff = end + 0.5            # cutoff_boundary

    # GaussianSmearing(start, stop=bins[-1], n_gaussians=nbins, width=None)
    offsets = jnp.linspace(start, float(bins[-1]), nbins).astype(jnp.float32)
    widths = (offsets[1] - offsets[0]) * jnp.ones_like(offsets)
    coeff = (-0.5 / (widths ** 2)).astype(jnp.float32)

    cell = jnp.array([L, L, L], dtype=jnp.float32)

    # --- inputs ---
    key = jax.random.PRNGKey(0)
    xyz = (jax.random.uniform(key, (N, 3), dtype=jnp.float32) * L)

    # --- run Pallas kernel ---
    count, g_r = rdf_pallas(xyz, cell, offsets, coeff, vol_bins, V, cutoff)
    count = jax.block_until_ready(count)
    g_r = jax.block_until_ready(g_r)

    # forward returns (count, bins, rdf)
    out = (count, bins, g_r)

    # --- check against pure-JAX reference ---
    count_ref, g_r_ref = rdf_reference(xyz, cell, offsets, coeff, vol_bins, V, cutoff)
    np.testing.assert_allclose(np.asarray(count), np.asarray(count_ref),
                               rtol=2e-4, atol=1e-6)
    np.testing.assert_allclose(np.asarray(g_r), np.asarray(g_r_ref),
                               rtol=2e-4, atol=1e-5)

    print("KERNEL_OK")
</pallas_src>

<mosaic_0001>
module attributes {stable_mosaic.version = 11 : i64} {
  func.func @_rdf_hist_kernel(%arg0: i32, %arg1: memref<8xf32, #tpu.memory_space<smem>>, %arg2: memref<128x3xf32, #tpu.memory_space<vmem>>, %arg3: memref<2x3x128xf32, #tpu.memory_space<vmem>>, %arg4: memref<64x128xf32, #tpu.memory_space<vmem>>, %arg5: memref<1x64x128xf32, #tpu.memory_space<vmem>>, %arg6: memref<64x128xf32, #tpu.memory_space<vmem>>) attributes {dimension_semantics = [#tpu.dimension_semantics<parallel>], iteration_bounds = array<i64: 2>, scalar_prefetch = 0 : i64, scratch_operands = 1 : i64, tpu.core_type = #tpu.core_type<tc>, window_params = [{transform_indices = @transform_0, window_bounds = array<i64: 8>}, {transform_indices = @transform_1, window_bounds = array<i64: 128, 3>}, {pipeline_mode = #tpu.pipeline_mode<synchronous>, transform_indices = @transform_2, window_bounds = array<i64: 2, 3, 128>}, {pipeline_mode = #tpu.pipeline_mode<synchronous>, transform_indices = @transform_3, window_bounds = array<i64: 64, 128>}, {transform_indices = @transform_4, window_bounds = array<i64: 1, 64, 128>}]} {
    %c0 = arith.constant 0 : index
    %0 = memref.load %arg1[%c0] : memref<8xf32, #tpu.memory_space<smem>>
    %c1 = arith.constant 1 : index
    %1 = memref.load %arg1[%c1] : memref<8xf32, #tpu.memory_space<smem>>
    %c2 = arith.constant 2 : index
    %2 = memref.load %arg1[%c2] : memref<8xf32, #tpu.memory_space<smem>>
    %c3 = arith.constant 3 : index
    %3 = memref.load %arg1[%c3] : memref<8xf32, #tpu.memory_space<smem>>
    %c4 = arith.constant 4 : index
    %4 = memref.load %arg1[%c4] : memref<8xf32, #tpu.memory_space<smem>>
    %c5 = arith.constant 5 : index
    %5 = memref.load %arg1[%c5] : memref<8xf32, #tpu.memory_space<smem>>
    %c6 = arith.constant 6 : index
    %6 = memref.load %arg1[%c6] : memref<8xf32, #tpu.memory_space<smem>>
    %c7 = arith.constant 7 : index
    %7 = memref.load %arg1[%c7] : memref<8xf32, #tpu.memory_space<smem>>
    %c0_0 = arith.constant 0 : index
    %c0_1 = arith.constant 0 : index
    %8 = vector.load %arg4[%c0_0, %c0_1] : memref<64x128xf32, #tpu.memory_space<vmem>>, vector<64x128xf32>
    %cst = arith.constant 0.000000e+00 : f32
    %9 = vector.broadcast %cst : f32 to vector<64x128xf32>
    %c0_2 = arith.constant 0 : index
    %c0_3 = arith.constant 0 : index
    %10 = vector.load %arg6[%c0_2, %c0_3] : memref<64x128xf32, #tpu.memory_space<vmem>>, vector<64x128xf32>
    tpu.vector_store %arg6[%c0_2, %c0_3], %9 {strides = array<i32>} : memref<64x128xf32, #tpu.memory_space<vmem>>, vector<64x128xf32>,
    %11 = tpu.iota {dimensions = array<i32: 1>} : vector<1x128xi32>
    %12 = tpu.iota {dimensions = array<i32: 0>} : vector<8x1xi32>
    %c128_i32 = arith.constant 128 : i32
    %13 = arith.muli %arg0, %c128_i32 : i32
    %c0_i32 = arith.constant 0 : i32
    %c2_i32 = arith.constant 2 : i32
    %14 = arith.addi %c0_i32, %c2_i32 : i32
    %c1_i32 = arith.constant 1 : i32
    scf.for %arg7 = %c0_i32 to %14 step %c1_i32  : i32 {
      %19 = arith.index_cast %arg7 : i32 to index
      %c0_10 = arith.constant 0 : index
      %c0_11 = arith.constant 0 : index
      %20 = vector.load %arg3[%19, %c0_10, %c0_11] : memref<2x3x128xf32, #tpu.memory_space<vmem>>, vector<1x3x128xf32>
      %21 = vector.shape_cast %20 : vector<1x3x128xf32> to vector<3x128xf32>
      %22 = vector.extract_strided_slice %21 {offsets = [0, 0], sizes = [1, 128], strides = [1, 1]} : vector<3x128xf32> to vector<1x128xf32>
      %23 = vector.extract_strided_slice %21 {offsets = [1, 0], sizes = [1, 128], strides = [1, 1]} : vector<3x128xf32> to vector<1x128xf32>
      %24 = vector.extract_strided_slice %21 {offsets = [2, 0], sizes = [1, 128], strides = [1, 1]} : vector<3x128xf32> to vector<1x128xf32>
      %c128_i32_12 = arith.constant 128 : i32
      %25 = arith.muli %arg7, %c128_i32_12 : i32
      %26 = vector.broadcast %25 : i32 to vector<1x128xi32>
      %27 = arith.addi %11, %26 : vector<1x128xi32>
      %c250_i32 = arith.constant 250 : i32
      %28 = vector.broadcast %c250_i32 : i32 to vector<1x128xi32>
      %29 = arith.cmpi slt, %27, %28 : vector<1x128xi32>
      %c0_i32_13 = arith.constant 0 : i32
      %c16_i32 = arith.constant 16 : i32
      %30 = arith.addi %c0_i32_13, %c16_i32 : i32
      %c1_i32_14 = arith.constant 1 : i32
      scf.for %arg8 = %c0_i32_13 to %30 step %c1_i32_14  : i32 {
        %c8_i32 = arith.constant 8 : i32
        %31 = arith.muli %arg8, %c8_i32 : i32
        %32 = tpu.assume_multiple %31, 8 : i32
        %33 = arith.index_cast %32 : i32 to index
        %c0_16 = arith.constant 0 : index
        %34 = vector.load %arg2[%33, %c0_16] : memref<128x3xf32, #tpu.memory_space<vmem>>, vector<8x3xf32>
        %35 = arith.addi %13, %32 : i32
        %36 = vector.broadcast %35 : i32 to vector<8x1xi32>
        %37 = arith.addi %12, %36 : vector<8x1xi32>
        %c250_i32_17 = arith.constant 250 : i32
        %38 = vector.broadcast %c250_i32_17 : i32 to vector<8x1xi32>
        %39 = arith.cmpi slt, %37, %38 : vector<8x1xi32>
        %40 = vector.extract_strided_slice %34 {offsets = [0, 0], sizes = [8, 1], strides = [1, 1]} : vector<8x3xf32> to vector<8x1xf32>
        %41 = vector.broadcast %22 : vector<1x128xf32> to vector<8x128xf32>
        %42 = vector.broadcast %40 : vector<8x1xf32> to vector<8x128xf32>
        %43 = arith.subf %41, %42 : vector<8x128xf32>
        %44 = vector.broadcast %3 : f32 to vector<8x128xf32>
        %45 = arith.mulf %43, %44 : vector<8x128xf32>
        %cst_18 = arith.constant 5.000000e-01 : f32
        %46 = vector.broadcast %cst_18 : f32 to vector<8x128xf32>
        %47 = arith.addf %45, %46 : vector<8x128xf32>
        %48 = math.floor %47 : vector<8x128xf32>
        %49 = vector.broadcast %0 : f32 to vector<8x128xf32>
        %50 = arith.mulf %49, %48 : vector<8x128xf32>
        %51 = arith.subf %43, %50 : vector<8x128xf32>
        %52 = vector.extract_strided_slice %34 {offsets = [0, 1], sizes = [8, 1], strides = [1, 1]} : vector<8x3xf32> to vector<8x1xf32>
        %53 = vector.broadcast %23 : vector<1x128xf32> to vector<8x128xf32>
        %54 = vector.broadcast %52 : vector<8x1xf32> to vector<8x128xf32>
        %55 = arith.subf %53, %54 : vector<8x128xf32>
        %56 = vector.broadcast %4 : f32 to vector<8x128xf32>
        %57 = arith.mulf %55, %56 : vector<8x128xf32>
        %cst_19 = arith.constant 5.000000e-01 : f32
        %58 = vector.broadcast %cst_19 : f32 to vector<8x128xf32>
        %59 = arith.addf %57, %58 : vector<8x128xf32>
        %60 = math.floor %59 : vector<8x128xf32>
        %61 = vector.broadcast %1 : f32 to vector<8x128xf32>
        %62 = arith.mulf %61, %60 : vector<8x128xf32>
        %63 = arith.subf %55, %62 : vector<8x128xf32>
        %64 = vector.extract_strided_slice %34 {offsets = [0, 2], sizes = [8, 1], strides = [1, 1]} : vector<8x3xf32> to vector<8x1xf32>
        %65 = vector.broadcast %24 : vector<1x128xf32> to vector<8x128xf32>
        %66 = vector.broadcast %64 : vector<8x1xf32> to vector<8x128xf32>
        %67 = arith.subf %65, %66 : vector<8x128xf32>
        %68 = vector.broadcast %5 : f32 to vector<8x128xf32>
        %69 = arith.mulf %67, %68 : vector<8x128xf32>
        %cst_20 = arith.constant 5.000000e-01 : f32
        %70 = vector.broadcast %cst_20 : f32 to vector<8x128xf32>
        %71 = arith.addf %69, %70 : vector<8x128xf32>
        %72 = math.floor %71 : vector<8x128xf32>
        %73 = vector.broadcast %2 : f32 to vector<8x128xf32>
        %74 = arith.mulf %73, %72 : vector<8x128xf32>
        %75 = arith.subf %67, %74 : vector<8x128xf32>
        %76 = arith.mulf %51, %51 : vector<8x128xf32>
        %77 = arith.mulf %63, %63 : vector<8x128xf32>
        %78 = arith.addf %76, %77 : vector<8x128xf32>
        %79 = arith.mulf %75, %75 : vector<8x128xf32>
        %80 = arith.addf %78, %79 : vector<8x128xf32>
        %81 = vector.broadcast %6 : f32 to vector<8x128xf32>
        %82 = arith.cmpf olt, %80, %81 : vector<8x128xf32>
        %cst_21 = arith.constant 0.000000e+00 : f32
        %83 = vector.broadcast %cst_21 : f32 to vector<8x128xf32>
        %84 = arith.cmpf one, %80, %83 : vector<8x128xf32>
        %85 = arith.andi %82, %84 : vector<8x128xi1>
        %86 = vector.broadcast %29 : vector<1x128xi1> to vector<8x128xi1>
        %87 = arith.andi %85, %86 : vector<8x128xi1>
        %88 = vector.broadcast %39 : vector<8x1xi1> to vector<8x128xi1>
        %89 = arith.andi %87, %88 : vector<8x128xi1>
        %90 = math.sqrt %80 : vector<8x128xf32>
        %91 = vector.broadcast %7 : f32 to vector<8x128xf32>
        %92 = arith.select %89, %90, %91 : vector<8x128xi1>, vector<8x128xf32>
        %c0_22 = arith.constant 0 : index
        %c0_23 = arith.constant 0 : index
        %93 = vector.load %arg6[%c0_22, %c0_23] : memref<64x128xf32, #tpu.memory_space<vmem>>, vector<64x128xf32>
        %94 = vector.extract_strided_slice %92 {offsets = [0, 0], sizes = [1, 128], strides = [1, 1]} : vector<8x128xf32> to vector<1x128xf32>
        %95 = vector.broadcast %94 : vector<1x128xf32> to vector<64x128xf32>
        %96 = arith.subf %95, %8 : vector<64x128xf32>
        %97 = arith.mulf %96, %96 : vector<64x128xf32>
        %cst_24 = arith.constant 0.000000e+00 : f32
        %98 = vector.broadcast %cst_24 : f32 to vector<64x128xf32>
        %99 = arith.subf %98, %97 : vector<64x128xf32>
        %100 = math.exp %99 : vector<64x128xf32>
        %101 = arith.addf %93, %100 : vector<64x128xf32>
        %102 = vector.extract_strided_slice %92 {offsets = [1, 0], sizes = [1, 128], strides = [1, 1]} : vector<8x128xf32> to vector<1x128xf32>
        %103 = vector.broadcast %102 : vector<1x128xf32> to vector<64x128xf32>
        %104 = arith.subf %103, %8 : vector<64x128xf32>
        %105 = arith.mulf %104, %104 : vector<64x128xf32>
        %cst_25 = arith.constant 0.000000e+00 : f32
        %106 = vector.broadcast %cst_25 : f32 to vector<64x128xf32>
        %107 = arith.subf %106, %105 : vector<64x128xf32>
        %108 = math.exp %107 : vector<64x128xf32>
        %109 = arith.addf %101, %108 : vector<64x128xf32>
        %110 = vector.extract_strided_slice %92 {offsets = [2, 0], sizes = [1, 128], strides = [1, 1]} : vector<8x128xf32> to vector<1x128xf32>
        %111 = vector.broadcast %110 : vector<1x128xf32> to vector<64x128xf32>
        %112 = arith.subf %111, %8 : vector<64x128xf32>
        %113 = arith.mulf %112, %112 : vector<64x128xf32>
        %cst_26 = arith.constant 0.000000e+00 : f32
        %114 = vector.broadcast %cst_26 : f32 to vector<64x128xf32>
        %115 = arith.subf %114, %113 : vector<64x128xf32>
        %116 = math.exp %115 : vector<64x128xf32>
        %117 = arith.addf %109, %116 : vector<64x128xf32>
        %118 = vector.extract_strided_slice %92 {offsets = [3, 0], sizes = [1, 128], strides = [1, 1]} : vector<8x128xf32> to vector<1x128xf32>
        %119 = vector.broadcast %118 : vector<1x128xf32> to vector<64x128xf32>
        %120 = arith.subf %119, %8 : vector<64x128xf32>
        %121 = arith.mulf %120, %120 : vector<64x128xf32>
        %cst_27 = arith.constant 0.000000e+00 : f32
        %122 = vector.broadcast %cst_27 : f32 to vector<64x128xf32>
        %123 = arith.subf %122, %121 : vector<64x128xf32>
        %124 = math.exp %123 : vector<64x128xf32>
        %125 = arith.addf %117, %124 : vector<64x128xf32>
        %126 = vector.extract_strided_slice %92 {offsets = [4, 0], sizes = [1, 128], strides = [1, 1]} : vector<8x128xf32> to vector<1x128xf32>
        %127 = vector.broadcast %126 : vector<1x128xf32> to vector<64x128xf32>
        %128 = arith.subf %127, %8 : vector<64x128xf32>
        %129 = arith.mulf %128, %128 : vector<64x128xf32>
        %cst_28 = arith.constant 0.000000e+00 : f32
        %130 = vector.broadcast %cst_28 : f32 to vector<64x128xf32>
        %131 = arith.subf %130, %129 : vector<64x128xf32>
        %132 = math.exp %131 : vector<64x128xf32>
        %133 = arith.addf %125, %132 : vector<64x128xf32>
        %134 = vector.extract_strided_slice %92 {offsets = [5, 0], sizes = [1, 128], strides = [1, 1]} : vector<8x128xf32> to vector<1x128xf32>
        %135 = vector.broadcast %134 : vector<1x128xf32> to vector<64x128xf32>
        %136 = arith.subf %135, %8 : vector<64x128xf32>
        %137 = arith.mulf %136, %136 : vector<64x128xf32>
        %cst_29 = arith.constant 0.000000e+00 : f32
        %138 = vector.broadcast %cst_29 : f32 to vector<64x128xf32>
        %139 = arith.subf %138, %137 : vector<64x128xf32>
        %140 = math.exp %139 : vector<64x128xf32>
        %141 = arith.addf %133, %140 : vector<64x128xf32>
        %142 = vector.extract_strided_slice %92 {offsets = [6, 0], sizes = [1, 128], strides = [1, 1]} : vector<8x128xf32> to vector<1x128xf32>
        %143 = vector.broadcast %142 : vector<1x128xf32> to vector<64x128xf32>
        %144 = arith.subf %143, %8 : vector<64x128xf32>
        %145 = arith.mulf %144, %144 : vector<64x128xf32>
        %cst_30 = arith.constant 0.000000e+00 : f32
        %146 = vector.broadcast %cst_30 : f32 to vector<64x128xf32>
        %147 = arith.subf %146, %145 : vector<64x128xf32>
        %148 = math.exp %147 : vector<64x128xf32>
        %149 = arith.addf %141, %148 : vector<64x128xf32>
        %150 = vector.extract_strided_slice %92 {offsets = [7, 0], sizes = [1, 128], strides = [1, 1]} : vector<8x128xf32> to vector<1x128xf32>
        %151 = vector.broadcast %150 : vector<1x128xf32> to vector<64x128xf32>
        %152 = arith.subf %151, %8 : vector<64x128xf32>
        %153 = arith.mulf %152, %152 : vector<64x128xf32>
        %cst_31 = arith.constant 0.000000e+00 : f32
        %154 = vector.broadcast %cst_31 : f32 to vector<64x128xf32>
        %155 = arith.subf %154, %153 : vector<64x128xf32>
        %156 = math.exp %155 : vector<64x128xf32>
        %157 = arith.addf %149, %156 : vector<64x128xf32>
        %c0_32 = arith.constant 0 : index
        %c0_33 = arith.constant 0 : index
        %158 = vector.load %arg6[%c0_32, %c0_33] : memref<64x128xf32, #tpu.memory_space<vmem>>, vector<64x128xf32>
        tpu.vector_store %arg6[%c0_32, %c0_33], %157 {strides = array<i32>} : memref<64x128xf32, #tpu.memory_space<vmem>>, vector<64x128xf32>,
      }
      %c16_i32_15 = arith.constant 16 : i32
    }
    %c2_i32_4 = arith.constant 2 : i32
    %c0_5 = arith.constant 0 : index
    %c0_6 = arith.constant 0 : index
    %15 = vector.load %arg6[%c0_5, %c0_6] : memref<64x128xf32, #tpu.memory_space<vmem>>, vector<64x128xf32>
    %c0_7 = arith.constant 0 : index
    %c0_8 = arith.constant 0 : index
    %c0_9 = arith.constant 0 : index
    %16 = vector.load %arg5[%c0_7, %c0_8, %c0_9] : memref<1x64x128xf32, #tpu.memory_space<vmem>>, vector<1x64x128xf32>
    %17 = vector.shape_cast %16 : vector<1x64x128xf32> to vector<64x128xf32>
    %18 = vector.shape_cast %15 : vector<64x128xf32> to vector<1x64x128xf32>
    tpu.vector_store %arg5[%c0_7, %c0_8, %c0_9], %18 {strides = array<i32>} : memref<1x64x128xf32, #tpu.memory_space<vmem>>, vector<1x64x128xf32>,
    return
  }
  func.func @transform_0(%arg0: i32) -> i32 {
    %c0_i32 = arith.constant 0 : i32
    %c0_i32_0 = arith.constant 0 : i32
    return %c0_i32 : i32
  }
  func.func @transform_1(%arg0: i32) -> (i32, i32) {
    %c0_i32 = arith.constant 0 : i32
    %c0_i32_0 = arith.constant 0 : i32
    return %arg0, %c0_i32 : i32, i32
  }
  func.func @transform_2(%arg0: i32) -> (i32, i32, i32) {
    %c0_i32 = arith.constant 0 : i32
    %c0_i32_0 = arith.constant 0 : i32
    %c0_i32_1 = arith.constant 0 : i32
    %c0_i32_2 = arith.constant 0 : i32
    return %c0_i32, %c0_i32_0, %c0_i32_1 : i32, i32, i32
  }
  func.func @transform_3(%arg0: i32) -> (i32, i32) {
    %c0_i32 = arith.constant 0 : i32
    %c0_i32_0 = arith.constant 0 : i32
    %c0_i32_1 = arith.constant 0 : i32
    return %c0_i32, %c0_i32_0 : i32, i32
  }
  func.func @transform_4(%arg0: i32) -> (i32, i32, i32) {
    %c0_i32 = arith.constant 0 : i32
    %c0_i32_0 = arith.constant 0 : i32
    %c0_i32_1 = arith.constant 0 : i32
    return %arg0, %c0_i32, %c0_i32_0 : i32, i32, i32
  }
}

</mosaic_0001>

<bundles_post_ra>
// kernel: tpu_custom_call.1
= control target key start
LH: loop header
LB: loop body
LE: loop exit
PB: predicated region body
PF: predicated region fallthrough
CT: control target
= control target key end

     0   :  { %s1728_s0 = inlined_call_operand.vmem [shape: f32[8], index: 0, kind: input, shape index: {}]   ;;  %s1729_s1 = inlined_call_operand.vmem [shape: f32[256,3], index: 1, kind: input, shape index: {}]   ;;  %s1730_s2 = inlined_call_operand.vmem [shape: f32[2,3,128], index: 2, kind: input, shape index: {}]   ;;  %s1731_s3 = inlined_call_operand.vmem [shape: f32[64,128], index: 3, kind: input, shape index: {}]   ;;  %s1732_s4 = inlined_call_operand.hbm [shape: f32[2,64,128], index: 4, kind: output, shape index: {}]  }
   0x1   :  { %1735 = sst [smem:[#allocation10_spill]] %s1728_s0 }
   0x2   :  { %9 = vsyncpa [#allocation5], 0 }
   0x3   :  { %10 = vsyncpa [#allocation4], 0 }
   0x4   :  { %12 = vsyncpa [#allocation4 + $0x1], 0  ;;  %s1254_s15 = smov 0   ;;  %s1256_s16 = smov 0  }
   0x5   :  { %s1258_s17 = smov 0   ;;  %s1260_s18 = smov 0  }
   0x6 LB: > { %s1275_s19 = sadd.s32 4294967295, %s1211_s18   ;;  %s890_s20 = sadd.s32 4294967294, %s1211_s18   ;;  %s1211_s18 = sphi %s1260_s18, %s1747_s18   ;;  %s1207_s17 = sphi %s1258_s17, %s1746_s17   ;;  %s1203_s16 = sphi %s1256_s16, %s1745_s16   ;;  %s1199_s15 = sphi %s1254_s15, %s1744_s15  }
   0x7   : > { %s1279_s21 = sadd.s32 1, %s1211_s18   ;;  %s114_s22 = sadd.s32 1, %s1207_s17 }
   0x8   : > { %s111_s23 = ssub.s32 %s1211_s18, %s1279_s21  ;;  %p124_p0 = scmp.ne.s32.totalorder %s1207_s17, %s1203_s16 }
   0x9   : > { %p112_p1 = scmp.eq.s32.totalorder %s111_s23, 0  ;;  %p125_p2 = scmp.eq.s32.totalorder %s1275_s19, 1 }
   0xa   : > { %p130_p3 = scmp.ne.s32.totalorder %s1203_s16, %s1199_s15  ;;  %p131_p4 = scmp.eq.s32.totalorder %s890_s20, 1 }
   0xb   : > { %s1290_s24 = scalar_select %p112_p1, %s1207_s17, %s114_s22  }
   0xc   : > { %p1292_p5 = por %p125_p2, %p124_p0  ;;  %p1296_p6 = por %p131_p4, %p130_p3 }
   0xd   : > { %p891_p7 = scmp.ge.s32.totalorder %s1211_s18, 1  ;;  %p138_p8 = scmp.lt.s32.totalorder %s1211_s18, 3 }
   0xe   : > { %p930_p9 = scmp.eq.s32.totalorder %s1275_s19, 0  ;;  %s1739_s0 = sld [smem:[#allocation10_spill]] }
   0xf   : > { %p1303_p10 = pnand %p891_p7, %p138_p8 }
  0x11   : > { %p922_p11 = pneg %p1303_p10 }
  0x13   : > { %p923_p12 = pnand %p930_p9, %p922_p11 }
  0x14   : > { %s151_s30 = sshll.u32 %s1739_s0, 4  ;;  %s152_s30 = int_to_ptr.vmem [resolvable:$true] %s151_s30 }
  0x15   : > { %s1122_s5 = scalar_lea.vmem %s152_s30, 16  ;;  %p1124_p0 = pneg %p923_p12 }
  0x16   : > { %p1123_p13 = scmp.ne.s32.totalorder %s152_s30, %s1122_s5  ;;  %p1130_p3 = scmp.lt.s32.totalorder %s152_s30, %s152_s30 }
  0x17   : > { %p1131_p4 = scmp.lt.s32.totalorder %s1122_s5, %s1122_s5 }
  0x18   : > { %p1125_p1 = pnand %p1124_p0, %p1123_p13 }
  0x19   : > { %p1132_p7 = por %p1131_p4, %p1130_p3 }
  0x1a   : > { %p1126_p2 = pneg %p1125_p1 }
  0x1c   : > { %p1133_p8 = pnand %p1132_p7, %p1126_p2 }
  0x1e   : > { %1136 = shalt.err (!%p1133_p8)
}
  0x1f   : > { %s1221_s6 = smov [#allocation3]   ;;  %179 = sbr.rel (%p1303_p10) target bundleno = 362 (0x16a), region = 36 }
  0x20   : > { %925 = dma.vmem_to_smem (!%p923_p12), %s152_s30, 16, %s1221_s6, [#allocation5]  }
  0x26   : > { %1190 = dma.done.wait (%p930_p9), [#allocation5], 16  }
  0x27   : > { %1192 = vsyncadd (%p930_p9), [#allocation5], 4294967280 }
  0x28   : > { %185 = sfence }
  0x29   : > { %s1733_s7 = sand.u32 1, %s1203_s16   ;;  %s897_s8 = sshll.u32 %s1275_s19, 4  ;;  %v1325_v0 = vld [vmem:[%s1731_s3] sm:$0xff]  ;;  %v1330_v1 = vld [vmem:[%s1731_s3 + $0x8] sm:$0xff]  ;;  %v1335_v2 = vld [vmem:[%s1731_s3 + $0x10] sm:$0xff]  ;;  %v236_v3 = vlaneseq  ;;  %v1222_v7 = vmov 0.0  }
  0x2a   : > { %1740 = vst [vmem:[#allocation9_spill] sm:$0xff] %v1325_v0  ;;  %s1339_s20 = sshll.u32 %s1733_s7, 6  ;;  %p1341_p9 = scmp.lt.s32.totalorder %s897_s8, 31  ;;  %v1348_v4 = vld [vmem:[%s1731_s3 + $0x18] sm:$0xff]  ;;  %v1353_v5 = vld [vmem:[%s1731_s3 + $0x20] sm:$0xff]  ;;  %v1358_v6 = vld [vmem:[%s1731_s3 + $0x28] sm:$0xff] }
  0x2b   : > { %228 = vst [vmem:[#allocation2] sm:$0xff] %v1222_v7  ;;  %229 = vst [vmem:[#allocation2 + $0x8] sm:$0xff] %v1222_v7  ;;  %s1360_s6 = sld [smem:[#allocation3]]  ;;  %v1365_v8 = vld [vmem:[%s1731_s3 + $0x30] sm:$0xff]  ;;  %v1370_v9 = vld [vmem:[%s1731_s3 + $0x38] sm:$0xff]  ;;  %v1372_v10 = vand.u32 127, %v236_v3 }
  0x2c   : > { %230 = vst [vmem:[#allocation2 + $0x10] sm:$0xff] %v1222_v7  ;;  %231 = vst [vmem:[#allocation2 + $0x18] sm:$0xff] %v1222_v7  ;;  %s1749_s8 = smov (!%p1341_p9, %s897_s8), 31  ;;  %v1376_v11 = vshrl.u32 %v236_v3, 7  ;;  %s1378_s13 = sld [smem:[#allocation3 + $0x1]] }
  0x2d   : > { %232 = vst [vmem:[#allocation2 + $0x20] sm:$0xff] %v1222_v7  ;;  %233 = vst [vmem:[#allocation2 + $0x28] sm:$0xff] %v1222_v7  ;;  %s1380_s14 = sld [smem:[#allocation3 + $0x2]]  ;;  %s898_s23 = sshll.u32 %s1749_s8, 3 }
  0x2e   : > { %234 = vst [vmem:[#allocation2 + $0x30] sm:$0xff] %v1222_v7  ;;  %235 = vst [vmem:[#allocation2 + $0x38] sm:$0xff] %v1222_v7  ;;  %s1382_s27 = sld [smem:[#allocation3 + $0x3]]  ;;  %s1387_s30 = scalar_lea.vmem %s1729_s1, %s898_s23 }
  0x2f   : > { %s1389_s5 = sld [smem:[#allocation3 + $0x4]]  ;;  %s1391_s9 = sld [smem:[#allocation3 + $0x5]] }
  0x30   : > { %s1393_s22 = sld [smem:[#allocation3 + $0x6]]  ;;  %s1395_s10 = sld [smem:[#allocation3 + $0x7]] }
  0x31   : > { %s906_s11 = sshll.u32 %s1275_s19, 7  ;;  %s1399_s12 = scalar_lea.vmem [#allocation6], %s1339_s20 }
  0x32   : > { %s1401_s7 = smov 0  }
  0x33 LB: >> { %s907_s8 = sshll.u32 %s1215_s7, 2  ;;  %s908_s23 = sshll.u32 %s1215_s7, 7  ;;  %s1215_s7 = sphi %s1401_s7, %s246_s7  }
  0x34   : >> { %s248_s0 = scalar_lea.vmem %s1730_s2, %s907_s8  ;;  %v251_v12 = vstv %s908_s23  ;;  %s1417_s20 = smov 0  }
  0x35   : >> { %v1411_v13 = vld [vmem:[%s248_s0] sm:$0x7]  ;;  %v1414_v14 = vadd.s32 %v251_v12, %v1372_v10 }
  0x37   : >> { %vm253_vm0 = vcmp.lt.s32.totalorder %v1414_v14, 250 }
  0x38 LB: >>> { %v1742_v0 = vld [vmem:[#allocation9_spill] sm:$0xff]  ;;  %v1223_v15 = vmov 2   ;;  %v1224_v16 = vmov 0   ;;  %s909_s0 = sshll.u32 %s1219_s20, 3  ;;  %v1225_v18 = vmov 1   ;;  %v302_v19 = vsub.s32 2, %v1376_v11  ;;  %s1219_s20 = sphi %s1417_s20, %s259_s20  }
  0x39   : >>> { %990 = vset.pattern.permute.xlu1 %v1223_v15  ;;  %988 = vset.pattern.permute.xlu0 %v1224_v16  ;;  %s261_s8 = scalar_lea.vmem %s1387_s30, %s909_s0  ;;  %v269_v20 = vsub.s32 0, %v1376_v11  ;;  %v286_v23 = vsub.s32 1, %v1376_v11  ;;  %v309_v24 = vstv %s1391_s9  ;;  %v277_v26 = vstv %s1382_s27  ;;  %s263_s23 = sadd.s32 %s909_s0, %s906_s11 }
  0x3a   : >>> { %v262_v17 = vld [vmem:[%s261_s8] sm:$0xff]  ;;  %v303_v21 = vrot.slane %v1411_v13, %v302_v19  ;;  %v293_v35 = vstv %s1389_s5  ;;  %v281_v38 = vstv %s1360_s6  ;;  %v313_v42 = vstv %s1380_s14  ;;  %s259_s20 = sadd.s32 1, %s1219_s20  }
  0x3b   : >>> { %305 = vperm.xlu1 %990, %v262_v17   ;;  %273 = vperm.xlu0 %988, %v262_v17   ;;  %v270_v22 = vrot.slane %v1411_v13, %v269_v20  ;;  %v287_v30 = vrot.slane %v1411_v13, %v286_v23  ;;  %v297_v45 = vstv %s1378_s13  ;;  %v321_v57 = vstv %s1393_s22  ;;  %p256_p10 = scmp.ge.s32.totalorder %s259_s20, 16  }
  0x3c   : >>> { %v264_v58 = vstv %s263_s23  ;;  %v338_v62 = vstv %s1395_s10  ;;  %s246_s7 = sadd.s32 (%p256_p10), 1, %s1215_s7  }
  0x3d   : >>> { %v265_v59 = vadd.s32 %v264_v58, %v1376_v11  ;;  %p243_p11 = scmp.ge.s32.totalorder (%p256_p10), %s246_s7, 2  }
  0x3f   : >>> { %989 = vset.pattern.permute.xlu0 %v1225_v18  ;;  %vm266_vm4 = vcmp.lt.s32.totalorder %v265_v59, 250 }
  0x40   : >>> { %289 = vperm.xlu0 %989, %v262_v17  }
  0x44   : >>> { %991 = vset.pattern.permute.xlu0 %v1223_v15 }
  0xba   : >>> { %v306_v25 = vpop.permute.xlu1 %305  ;;  %v274_v27 = vpop.permute.xlu0 %273 }
  0xbb   : >>> { %v308_v28 = vsub.f32 %v303_v21, %v306_v25  ;;  %v276_v29 = vsub.f32 %v270_v22, %v274_v27 }
  0xbd   : >>> { %v310_v31 = vmul.f32 %v309_v24, %v308_v28  ;;  %v278_v32 = vmul.f32 %v277_v26, %v276_v29 }
  0xbf   : >>> { %v311_v33 = vadd.f32 0.5, %v310_v31  ;;  %v279_v34 = vadd.f32 0.5, %v278_v32  ;;  %v290_v36 = vpop.permute.xlu0 %289 }
  0xc0   : >>> { %v292_v37 = vsub.f32 %v287_v30, %v290_v36 }
  0xc1   : >>> { %v280_v39 = vfloor.f32 %v279_v34  ;;  %v312_v40 = vfloor.f32 %v311_v33 }
  0xc2   : >>> { %v294_v41 = vmul.f32 %v293_v35, %v292_v37 }
  0xc3   : >>> { %v282_v43 = vmul.f32 %v281_v38, %v280_v39  ;;  %v314_v46 = vmul.f32 %v313_v42, %v312_v40  ;;  %v506_v38 = vsub.s32 3, %v1376_v11  ;;  %v558_v40 = vsub.s32 4, %v1376_v11 }
  0xc4   : >>> { %v295_v44 = vadd.f32 0.5, %v294_v41 }
  0xc5   : >>> { %v283_v48 = vsub.f32 %v276_v29, %v282_v43  ;;  %v315_v50 = vsub.f32 %v308_v28, %v314_v46 }
  0xc6   : >>> { %v296_v47 = vfloor.f32 %v295_v44  ;;  %v610_v44 = vsub.s32 5, %v1376_v11 }
  0xc7   : >>> { %v316_v52 = vmul.f32 %v283_v48, %v283_v48  ;;  %v319_v54 = vmul.f32 %v315_v50, %v315_v50 }
  0xc8   : >>> { %v298_v49 = vmul.f32 %v297_v45, %v296_v47 }
  0xca   : >>> { %v299_v51 = vsub.f32 %v292_v37, %v298_v49 }
  0xcc   : >>> { %v317_v53 = vmul.f32 %v299_v51, %v299_v51 }
  0xce   : >>> { %v318_v55 = vadd.f32 %v317_v53, %v316_v52 }
  0xd0   : >>> { %v320_v56 = vadd.f32 %v319_v54, %v318_v55 }
  0xd2   : >>> { %992 = vrsqrt.f32 %v320_v56  ;;  %vm322_vm1 = vcmp.lt.f32.partialorder %v320_v56, %v321_v57  ;;  %vm323_vm2 = vcmp.ne.f32.partialorder %v320_v56, 0.0  ;;  %vm333_vm6 = vcmp.eq.f32.partialorder %v320_v56, inf }
  0xd3   : >>> { %vm324_vm3 = vmand %vm322_vm1, %vm323_vm2  ;;  %v336_v63 = vand.u32 2147483648, %v320_v56  ;;  %vm335_vm7 = vcmp.eq.f32.partialorder %v320_v56, 0.0 }
  0xd4   : >>> { %vm327_vm5 = vmand %vm324_vm3, %vm253_vm0 }
  0xd5   : >>> { %vm330_vm8 = vmand %vm327_vm5, %vm266_vm4 }
  0xdc   : >>> { %v993_v60 = vpop.eup %992 }
  0xdd   : >>> { %v332_v61 = vmul.f32 %v993_v60, %v320_v56 }
  0xdf   : >>> { %v334_v3 = vsel %vm333_vm6, %v320_v56, %v332_v61 }
  0xe0   : >>> { %v337_v7 = vsel %vm335_vm7, %v336_v63, %v334_v3 }
  0xe1   : >>> { %v1451_v12 = vsel %vm330_vm8, %v337_v7, %v338_v62 }
  0xe2   : >>> { %v351_v15 = vrot.slane %v1451_v12, %v269_v20  ;;  %v403_v32 = vrot.slane %v1451_v12, %v286_v23  ;;  %v455_v60 = vrot.slane %v1451_v12, %v302_v19 }
  0xe4   : >>> { %v352_v16 = vsub.f32 %v351_v15, %v1742_v0  ;;  %v353_v17 = vsub.f32 %v351_v15, %v1330_v1  ;;  %v354_v18 = vsub.f32 %v351_v15, %v1335_v2  ;;  %v355_v21 = vsub.f32 %v351_v15, %v1348_v4 }
  0xe5   : >>> { %v356_v22 = vsub.f32 %v351_v15, %v1353_v5  ;;  %v357_v24 = vsub.f32 %v351_v15, %v1358_v6  ;;  %v358_v25 = vsub.f32 %v351_v15, %v1365_v8  ;;  %v359_v26 = vsub.f32 %v351_v15, %v1370_v9 }
  0xe6   : >>> { %v360_v27 = vmul.f32 %v352_v16, %v352_v16  ;;  %v361_v28 = vmul.f32 %v353_v17, %v353_v17  ;;  %v362_v29 = vmul.f32 %v354_v18, %v354_v18  ;;  %v363_v20 = vmul.f32 %v355_v21, %v355_v21 }
  0xe7   : >>> { %v364_v30 = vmul.f32 %v356_v22, %v356_v22  ;;  %v365_v33 = vmul.f32 %v357_v24, %v357_v24  ;;  %v366_v34 = vmul.f32 %v358_v25, %v358_v25  ;;  %v367_v36 = vmul.f32 %v359_v26, %v359_v26 }
  0xe8   : >>> { %v368_v31 = vsub.f32 0.0, %v360_v27  ;;  %v369_v35 = vsub.f32 0.0, %v361_v28  ;;  %v370_v37 = vsub.f32 0.0, %v362_v29  ;;  %v371_v39 = vsub.f32 0.0, %v363_v20 }
  0xe9   : >>> { %v372_v41 = vsub.f32 0.0, %v364_v30  ;;  %v404_v43 = vsub.f32 %v403_v32, %v1742_v0  ;;  %v373_v45 = vsub.f32 0.0, %v365_v33  ;;  %v374_v46 = vsub.f32 0.0, %v366_v34 }
  0xea   : >>> { %v376_v42 = vmul.f32 1.442695, %v368_v31  ;;  %v378_v47 = vmul.f32 1.442695, %v369_v35  ;;  %v375_v23 = vsub.f32 0.0, %v367_v36  ;;  %v405_v49 = vsub.f32 %v403_v32, %v1330_v1 }
  0xeb   : >>> { %v380_v48 = vmul.f32 1.442695, %v370_v37  ;;  %v406_v50 = vsub.f32 %v403_v32, %v1335_v2  ;;  %v382_v51 = vmul.f32 1.442695, %v371_v39  ;;  %v407_v52 = vsub.f32 %v403_v32, %v1348_v4 }
  0xec   : >>> { %v408_v53 = vsub.f32 %v403_v32, %v1353_v5  ;;  %v409_v54 = vsub.f32 %v403_v32, %v1358_v6  ;;  %994 = vpow2.f32 %v376_v42  ;;  %v384_v55 = vmul.f32 1.442695, %v372_v41 }
  0xed   : >>> { %v410_v56 = vsub.f32 %v403_v32, %v1365_v8  ;;  %v412_v57 = vmul.f32 %v404_v43, %v404_v43  ;;  %996 = vpow2.f32 %v378_v47  ;;  %v386_v58 = vmul.f32 1.442695, %v373_v45 }
  0xee   : >>> { %v411_v59 = vsub.f32 %v403_v32, %v1370_v9  ;;  %998 = vpow2.f32 %v380_v48  ;;  %v388_v61 = vmul.f32 1.442695, %v374_v46  ;;  %v413_v62 = vmul.f32 %v405_v49, %v405_v49  ;;  %v342_v49 = vld [vmem:[#allocation2 + $0x10] sm:$0xff] }
  0xef   : >>> { %v414_v63 = vmul.f32 %v406_v50, %v406_v50  ;;  %1000 = vpow2.f32 %v382_v51  ;;  %v415_v3 = vmul.f32 %v407_v52, %v407_v52  ;;  %v416_v7 = vmul.f32 %v408_v53, %v408_v53 }
  0xf0   : >>> { %v417_v15 = vmul.f32 %v409_v54, %v409_v54  ;;  %1002 = vpow2.f32 %v384_v55  ;;  %v390_v16 = vmul.f32 1.442695, %v375_v23  ;;  %v418_v17 = vmul.f32 %v410_v56, %v410_v56  ;;  %v343_v54 = vld [vmem:[#allocation2 + $0x18] sm:$0xff] }
  0xf1   : >>> { %v420_v18 = vsub.f32 0.0, %v412_v57  ;;  %v662_v21 = vsub.s32 6, %v1376_v11  ;;  %v714_v22 = vsub.s32 7, %v1376_v11  ;;  %1004 = vpow2.f32 %v386_v58 }
  0xf2   : >>> { %v419_v24 = vmul.f32 %v411_v59, %v411_v59  ;;  %1006 = vpow2.f32 %v388_v61  ;;  %v421_v19 = vsub.f32 0.0, %v413_v62  ;;  %v422_v25 = vsub.f32 0.0, %v414_v63 }
  0xf3   : >>> { %v1482_v26 = vrot.slane %v1451_v12, %v506_v38  ;;  %v423_v27 = vsub.f32 0.0, %v415_v3  ;;  %v424_v28 = vsub.f32 0.0, %v416_v7  ;;  %v425_v29 = vsub.f32 0.0, %v417_v15  ;;  %v340_v38 = vld [vmem:[#allocation2] sm:$0xff] }
  0xf4   : >>> { %v456_v20 = vsub.f32 %v455_v60, %v1742_v0  ;;  %1008 = vpow2.f32 %v390_v16  ;;  %v426_v30 = vsub.f32 0.0, %v418_v17  ;;  %v428_v31 = vmul.f32 1.442695, %v420_v18  ;;  %v344_v3 = vld [vmem:[#allocation2 + $0x20] sm:$0xff]  ;;  %v345_v18 = vld [vmem:[#allocation2 + $0x28] sm:$0xff] }
  0xf5   : >>> { %v1486_v32 = vrot.slane %v1451_v12, %v558_v40  ;;  %v427_v33 = vsub.f32 0.0, %v419_v24  ;;  %v457_v34 = vsub.f32 %v455_v60, %v1330_v1  ;;  %v1490_v35 = vrot.slane %v1451_v12, %v610_v44  ;;  %v341_v44 = vld [vmem:[#allocation2 + $0x8] sm:$0xff] }
  0xf6   : >>> { %v1493_v36 = vrot.slane %v1451_v12, %v662_v21  ;;  %v995_v37 = vpop.eup %994  ;;  %v430_v39 = vmul.f32 1.442695, %v421_v19  ;;  %v432_v41 = vmul.f32 1.442695, %v422_v25  ;;  %v458_v42 = vsub.f32 %v455_v60, %v1335_v2  ;;  %v346_v21 = vld [vmem:[#allocation2 + $0x30] sm:$0xff] }
  0xf7   : >>> { %v1497_v43 = vrot.slane %v1451_v12, %v714_v22  ;;  %v997_v40 = vpop.eup %996  ;;  %v434_v45 = vmul.f32 1.442695, %v423_v27  ;;  %v436_v46 = vmul.f32 1.442695, %v424_v28  ;;  %v438_v47 = vmul.f32 1.442695, %v425_v29 }
  0xf8   : >>> { %v464_v23 = vmul.f32 %v456_v20, %v456_v20  ;;  %v999_v48 = vpop.eup %998  ;;  %1010 = vpow2.f32 %v428_v31  ;;  %v440_v50 = vmul.f32 1.442695, %v426_v30  ;;  %v459_v51 = vsub.f32 %v455_v60, %v1348_v4 }
  0xf9   : >>> { %v460_v52 = vsub.f32 %v455_v60, %v1353_v5  ;;  %v1001_v53 = vpop.eup %1000  ;;  %v442_v55 = vmul.f32 1.442695, %v427_v33  ;;  %v461_v12 = vsub.f32 %v455_v60, %v1358_v6  ;;  %v462_v56 = vsub.f32 %v455_v60, %v1365_v8 }
  0xfa   : >>> { %v465_v57 = vmul.f32 %v457_v34, %v457_v34  ;;  %v1003_v58 = vpop.eup %1002  ;;  %v392_v59 = vadd.f32 %v995_v37, %v340_v38  ;;  %1012 = vpow2.f32 %v430_v39  ;;  %v463_v61 = vsub.f32 %v455_v60, %v1370_v9  ;;  %v347_v60 = vld [vmem:[#allocation2 + $0x38] sm:$0xff] }
  0xfb   : >>> { %v466_v62 = vmul.f32 %v458_v42, %v458_v42  ;;  %v1005_v63 = vpop.eup %1004  ;;  %v393_v7 = vadd.f32 %v997_v40, %v341_v44  ;;  %v394_v15 = vadd.f32 %v999_v48, %v342_v49  ;;  %1014 = vpow2.f32 %v432_v41 }
  0xfc   : >>> { %v472_v16 = vsub.f32 0.0, %v464_v23  ;;  %v1007_v17 = vpop.eup %1006  ;;  %v395_v22 = vadd.f32 %v1001_v53, %v343_v54  ;;  %1016 = vpow2.f32 %v434_v45  ;;  %v467_v24 = vmul.f32 %v459_v51, %v459_v51 }
  0xfd   : >>> { %v468_v19 = vmul.f32 %v460_v52, %v460_v52  ;;  %1018 = vpow2.f32 %v436_v46  ;;  %v469_v25 = vmul.f32 %v461_v12, %v461_v12  ;;  %v470_v27 = vmul.f32 %v462_v56, %v462_v56 }
  0xfe   : >>> { %v473_v28 = vsub.f32 0.0, %v465_v57  ;;  %v1009_v29 = vpop.eup %1008  ;;  %v396_v20 = vadd.f32 %v1003_v58, %v344_v3  ;;  %1020 = vpow2.f32 %v438_v47  ;;  %v471_v30 = vmul.f32 %v463_v61, %v463_v61 }
  0xff   : >>> { %v474_v31 = vsub.f32 0.0, %v466_v62  ;;  %v397_v33 = vadd.f32 %v1005_v63, %v345_v18  ;;  %v398_v34 = vadd.f32 %v1007_v17, %v346_v21  ;;  %1022 = vpow2.f32 %v440_v50 }
 0x100   : >>> { %v480_v37 = vmul.f32 1.442695, %v472_v16  ;;  %1024 = vpow2.f32 %v442_v55  ;;  %v475_v38 = vsub.f32 0.0, %v467_v24  ;;  %v476_v39 = vsub.f32 0.0, %v468_v19 }
 0x101   : >>> { %v508_v41 = vsub.f32 %v1482_v26, %v1742_v0  ;;  %v399_v42 = vadd.f32 %v1009_v29, %v347_v60  ;;  %v477_v40 = vsub.f32 0.0, %v469_v25  ;;  %v478_v45 = vsub.f32 0.0, %v470_v27 }
 0x102   : >>> { %v482_v46 = vmul.f32 1.442695, %v473_v28  ;;  %v1011_v23 = vpop.eup %1010  ;;  %v479_v48 = vsub.f32 0.0, %v471_v30  ;;  %v484_v44 = vmul.f32 1.442695, %v474_v31  ;;  %v509_v47 = vsub.f32 %v1482_v26, %v1330_v1 }
 0x103   : >>> { %v510_v49 = vsub.f32 %v1482_v26, %v1335_v2  ;;  %1026 = vpow2.f32 %v480_v37  ;;  %v511_v50 = vsub.f32 %v1482_v26, %v1348_v4  ;;  %v512_v51 = vsub.f32 %v1482_v26, %v1353_v5 }
 0x104   : >>> { %v513_v52 = vsub.f32 %v1482_v26, %v1358_v6  ;;  %v1013_v53 = vpop.eup %1012  ;;  %v444_v54 = vadd.f32 %v1011_v23, %v392_v59  ;;  %v486_v55 = vmul.f32 1.442695, %v475_v38  ;;  %v488_v12 = vmul.f32 1.442695, %v476_v39 }
 0x105   : >>> { %v516_v56 = vmul.f32 %v508_v41, %v508_v41  ;;  %v1015_v57 = vpop.eup %1014  ;;  %1028 = vpow2.f32 %v482_v46  ;;  %v490_v58 = vmul.f32 1.442695, %v477_v40  ;;  %v514_v61 = vsub.f32 %v1482_v26, %v1365_v8 }
 0x106   : >>> { %v515_v62 = vsub.f32 %v1482_v26, %v1370_v9  ;;  %v1017_v63 = vpop.eup %1016  ;;  %v445_v3 = vadd.f32 %v1013_v53, %v393_v7  ;;  %v492_v16 = vmul.f32 1.442695, %v478_v45  ;;  %v517_v17 = vmul.f32 %v509_v47, %v509_v47 }
 0x107   : >>> { %v518_v18 = vmul.f32 %v510_v49, %v510_v49  ;;  %v1019_v21 = vpop.eup %1018  ;;  %1030 = vpow2.f32 %v484_v44  ;;  %v519_v59 = vmul.f32 %v511_v50, %v511_v50  ;;  %v520_v24 = vmul.f32 %v512_v51, %v512_v51 }
 0x108   : >>> { %v521_v19 = vmul.f32 %v513_v52, %v513_v52  ;;  %v1021_v25 = vpop.eup %1020  ;;  %v446_v27 = vadd.f32 %v1015_v57, %v394_v15  ;;  %1032 = vpow2.f32 %v486_v55  ;;  %v494_v28 = vmul.f32 1.442695, %v479_v48 }
 0x109   : >>> { %v524_v29 = vsub.f32 0.0, %v516_v56  ;;  %v1023_v60 = vpop.eup %1022  ;;  %v447_v30 = vadd.f32 %v1017_v63, %v395_v22  ;;  %1034 = vpow2.f32 %v488_v12  ;;  %v522_v31 = vmul.f32 %v514_v61, %v514_v61 }
 0x10a   : >>> { %v523_v26 = vmul.f32 %v515_v62, %v515_v62  ;;  %v1025_v37 = vpop.eup %1024  ;;  %v448_v7 = vadd.f32 %v1019_v21, %v396_v20  ;;  %1036 = vpow2.f32 %v490_v58  ;;  %v525_v38 = vsub.f32 0.0, %v517_v17 }
 0x10b   : >>> { %v526_v39 = vsub.f32 0.0, %v518_v18  ;;  %1038 = vpow2.f32 %v492_v16  ;;  %v527_v41 = vsub.f32 0.0, %v519_v59  ;;  %v528_v40 = vsub.f32 0.0, %v520_v24 }
 0x10c   : >>> { %v529_v45 = vsub.f32 0.0, %v521_v19  ;;  %v449_v46 = vadd.f32 %v1021_v25, %v397_v33  ;;  %v450_v23 = vadd.f32 %v1023_v60, %v398_v34  ;;  %1040 = vpow2.f32 %v494_v28 }
 0x10d   : >>> { %v532_v15 = vmul.f32 1.442695, %v524_v29  ;;  %v1027_v48 = vpop.eup %1026  ;;  %v451_v44 = vadd.f32 %v1025_v37, %v399_v42  ;;  %v530_v47 = vsub.f32 0.0, %v522_v31  ;;  %v531_v22 = vsub.f32 0.0, %v523_v26 }
 0x10e   : >>> { %v560_v49 = vsub.f32 %v1486_v32, %v1742_v0  ;;  %v496_v50 = vadd.f32 %v1027_v48, %v444_v54  ;;  %v534_v20 = vmul.f32 1.442695, %v525_v38  ;;  %v536_v51 = vmul.f32 1.442695, %v526_v39 }
 0x10f   : >>> { %v561_v52 = vsub.f32 %v1486_v32, %v1330_v1  ;;  %v1029_v53 = vpop.eup %1028  ;;  %v538_v55 = vmul.f32 1.442695, %v527_v41  ;;  %v540_v12 = vmul.f32 1.442695, %v528_v40  ;;  %v542_v33 = vmul.f32 1.442695, %v529_v45 }
 0x110   : >>> { %v562_v34 = vsub.f32 %v1486_v32, %v1335_v2  ;;  %v1526_v56 = vadd.f32 %v1029_v53, %v445_v3  ;;  %1042 = vpow2.f32 %v532_v15  ;;  %v563_v42 = vsub.f32 %v1486_v32, %v1348_v4 }
 0x111   : >>> { %v564_v54 = vsub.f32 %v1486_v32, %v1353_v5  ;;  %v1031_v57 = vpop.eup %1030  ;;  %v544_v58 = vmul.f32 1.442695, %v530_v47  ;;  %v546_v61 = vmul.f32 1.442695, %v531_v22  ;;  %v565_v62 = vsub.f32 %v1486_v32, %v1358_v6 }
 0x112   : >>> { %v568_v63 = vmul.f32 %v560_v49, %v560_v49  ;;  %v1033_v16 = vpop.eup %1032  ;;  %v1534_v17 = vadd.f32 %v1031_v57, %v446_v27  ;;  %1044 = vpow2.f32 %v534_v20  ;;  %v566_v3 = vsub.f32 %v1486_v32, %v1365_v8 }
 0x113   : >>> { %v569_v18 = vmul.f32 %v561_v52, %v561_v52  ;;  %v1035_v21 = vpop.eup %1034  ;;  %v1538_v59 = vadd.f32 %v1033_v16, %v447_v30  ;;  %1046 = vpow2.f32 %v536_v51  ;;  %v567_v24 = vsub.f32 %v1486_v32, %v1370_v9 }
 0x114   : >>> { %v570_v19 = vmul.f32 %v562_v34, %v562_v34  ;;  %v1037_v25 = vpop.eup %1036  ;;  %v1542_v28 = vadd.f32 %v1035_v21, %v448_v7  ;;  %1048 = vpow2.f32 %v538_v55  ;;  %v571_v29 = vmul.f32 %v563_v42, %v563_v42 }
 0x115   : >>> { %v572_v27 = vmul.f32 %v564_v54, %v564_v54  ;;  %v1039_v60 = vpop.eup %1038  ;;  %v1544_v31 = vadd.f32 %v1037_v25, %v449_v46  ;;  %1050 = vpow2.f32 %v540_v12  ;;  %v573_v26 = vmul.f32 %v565_v62, %v565_v62 }
 0x116   : >>> { %v576_v37 = vsub.f32 0.0, %v568_v63  ;;  %v1041_v38 = vpop.eup %1040  ;;  %v1546_v30 = vadd.f32 %v1039_v60, %v450_v23  ;;  %1052 = vpow2.f32 %v542_v33  ;;  %v574_v39 = vmul.f32 %v566_v3, %v566_v3 }
 0x117   : >>> { %v577_v41 = vsub.f32 0.0, %v569_v18  ;;  %v1548_v32 = vadd.f32 %v1041_v38, %v451_v44  ;;  %v575_v40 = vmul.f32 %v567_v24, %v567_v24  ;;  %v578_v7 = vsub.f32 0.0, %v570_v19 }
 0x118   : >>> { %v612_v45 = vsub.f32 %v1490_v35, %v1742_v0  ;;  %1054 = vpow2.f32 %v544_v58  ;;  %v579_v15 = vsub.f32 0.0, %v571_v29  ;;  %v580_v46 = vsub.f32 0.0, %v572_v27 }
 0x119   : >>> { %v613_v48 = vsub.f32 %v1490_v35, %v1330_v1  ;;  %1056 = vpow2.f32 %v546_v61  ;;  %v581_v47 = vsub.f32 0.0, %v573_v26  ;;  %v584_v23 = vmul.f32 1.442695, %v576_v37 }
 0x11a   : >>> { %v614_v22 = vsub.f32 %v1490_v35, %v1335_v2  ;;  %v1043_v49 = vpop.eup %1042  ;;  %v582_v44 = vsub.f32 0.0, %v574_v39  ;;  %v586_v20 = vmul.f32 1.442695, %v577_v41  ;;  %v615_v51 = vsub.f32 %v1490_v35, %v1348_v4 }
 0x11b   : >>> { %v616_v52 = vsub.f32 %v1490_v35, %v1353_v5  ;;  %v1560_v53 = vadd.f32 %v1043_v49, %v496_v50  ;;  %v583_v55 = vsub.f32 0.0, %v575_v40  ;;  %v588_v12 = vmul.f32 1.442695, %v578_v7 }
 0x11c   : >>> { %v620_v33 = vmul.f32 %v612_v45, %v612_v45  ;;  %v1045_v34 = vpop.eup %1044  ;;  %v590_v42 = vmul.f32 1.442695, %v579_v15  ;;  %v592_v54 = vmul.f32 1.442695, %v580_v46  ;;  %v617_v57 = vsub.f32 %v1490_v35, %v1358_v6 }
 0x11d   : >>> { %v621_v58 = vmul.f32 %v613_v48, %v613_v48  ;;  %v1564_v61 = vpop.eup %1046  ;;  %1058 = vpow2.f32 %v584_v23  ;;  %v618_v62 = vsub.f32 %v1490_v35, %v1365_v8  ;;  %v619_v50 = vsub.f32 %v1490_v35, %v1370_v9 }
 0x11e   : >>> { %v622_v63 = vmul.f32 %v614_v22, %v614_v22  ;;  %v1570_v16 = vpop.eup %1048  ;;  %1060 = vpow2.f32 %v586_v20  ;;  %v594_v3 = vmul.f32 1.442695, %v581_v47  ;;  %v623_v18 = vmul.f32 %v615_v51, %v615_v51 }
 0x11f   : >>> { %v624_v21 = vmul.f32 %v616_v52, %v616_v52  ;;  %v1572_v24 = vpop.eup %1050  ;;  %v1575_v19 = vadd.f32 %v1045_v34, %v1526_v56  ;;  %1062 = vpow2.f32 %v588_v12  ;;  %v596_v25 = vmul.f32 1.442695, %v582_v44 }
 0x120   : >>> { %v628_v29 = vsub.f32 0.0, %v620_v33  ;;  %v1577_v27 = vpop.eup %1052  ;;  %1064 = vpow2.f32 %v590_v42  ;;  %v598_v60 = vmul.f32 1.442695, %v583_v55  ;;  %v625_v35 = vmul.f32 %v617_v57, %v617_v57 }
 0x121   : >>> { %v629_v26 = vsub.f32 0.0, %v621_v58  ;;  %1066 = vpow2.f32 %v592_v54  ;;  %v626_v37 = vmul.f32 %v618_v62, %v618_v62  ;;  %v627_v38 = vmul.f32 %v619_v50, %v619_v50 }
 0x122   : >>> { %v630_v39 = vsub.f32 0.0, %v622_v63  ;;  %v1579_v41 = vpop.eup %1054  ;;  %1068 = vpow2.f32 %v594_v3  ;;  %v631_v40 = vsub.f32 0.0, %v623_v18  ;;  %v632_v7 = vsub.f32 0.0, %v624_v21 }
 0x123   : >>> { %v664_v56 = vsub.f32 %v1493_v36, %v1742_v0  ;;  %v1583_v45 = vpop.eup %1056  ;;  %1070 = vpow2.f32 %v596_v25  ;;  %v636_v15 = vmul.f32 1.442695, %v628_v29  ;;  %v665_v46 = vsub.f32 %v1493_v36, %v1330_v1 }
 0x124   : >>> { %v666_v48 = vsub.f32 %v1493_v36, %v1335_v2  ;;  %1072 = vpow2.f32 %v598_v60  ;;  %v633_v47 = vsub.f32 0.0, %v625_v35  ;;  %v638_v23 = vmul.f32 1.442695, %v629_v26 }
 0x125   : >>> { %v667_v22 = vsub.f32 %v1493_v36, %v1348_v4  ;;  %v634_v49 = vsub.f32 0.0, %v626_v37  ;;  %v635_v44 = vsub.f32 0.0, %v627_v38  ;;  %v640_v20 = vmul.f32 1.442695, %v630_v39 }
 0x126   : >>> { %v668_v51 = vsub.f32 %v1493_v36, %v1353_v5  ;;  %v642_v52 = vmul.f32 1.442695, %v631_v40  ;;  %v644_v55 = vmul.f32 1.442695, %v632_v7  ;;  %v669_v12 = vsub.f32 %v1493_v36, %v1358_v6 }
 0x127   : >>> { %v672_v33 = vmul.f32 %v664_v56, %v664_v56  ;;  %v1595_v34 = vpop.eup %1058  ;;  %1074 = vpow2.f32 %v636_v15  ;;  %v670_v42 = vsub.f32 %v1493_v36, %v1365_v8  ;;  %v673_v54 = vmul.f32 %v665_v46, %v665_v46 }
 0x128   : >>> { %v674_v57 = vmul.f32 %v666_v48, %v666_v48  ;;  %v1599_v58 = vpop.eup %1060  ;;  %1076 = vpow2.f32 %v638_v23  ;;  %v646_v62 = vmul.f32 1.442695, %v633_v47  ;;  %v671_v50 = vsub.f32 %v1493_v36, %v1370_v9 }
 0x129   : >>> { %v675_v63 = vmul.f32 %v667_v22, %v667_v22  ;;  %v1603_v3 = vpop.eup %1062  ;;  %1078 = vpow2.f32 %v640_v20  ;;  %v648_v18 = vmul.f32 1.442695, %v634_v49  ;;  %v650_v21 = vmul.f32 1.442695, %v635_v44 }
 0x12a   : >>> { %v676_v25 = vmul.f32 %v668_v51, %v668_v51  ;;  %v1605_v29 = vpop.eup %1064  ;;  %1080 = vpow2.f32 %v642_v52  ;;  %v677_v60 = vmul.f32 %v669_v12, %v669_v12  ;;  %v680_v35 = vsub.f32 0.0, %v672_v33 }
 0x12b   : >>> { %v681_v26 = vsub.f32 0.0, %v673_v54  ;;  %v1607_v37 = vpop.eup %1066  ;;  %v1611_v38 = vadd.f32 %v1564_v61, %v1534_v17  ;;  %1082 = vpow2.f32 %v644_v55  ;;  %v678_v36 = vmul.f32 %v670_v42, %v670_v42 }
 0x12c   : >>> { %v682_v39 = vsub.f32 0.0, %v674_v57  ;;  %v1613_v40 = vpop.eup %1068  ;;  %v1617_v7 = vadd.f32 %v1570_v16, %v1538_v59  ;;  %1084 = vpow2.f32 %v646_v62  ;;  %v679_v56 = vmul.f32 %v671_v50, %v671_v50 }
 0x12d   : >>> { %v683_v15 = vsub.f32 0.0, %v675_v63  ;;  %v1619_v46 = vpop.eup %1070  ;;  %v1623_v48 = vadd.f32 %v1572_v24, %v1542_v28  ;;  %1086 = vpow2.f32 %v648_v18  ;;  %v684_v17 = vsub.f32 0.0, %v676_v25 }
 0x12e   : >>> { %v688_v61 = vmul.f32 1.442695, %v680_v35  ;;  %v1625_v47 = vpop.eup %1072  ;;  %1088 = vpow2.f32 %v650_v21  ;;  %v685_v23 = vsub.f32 0.0, %v677_v60  ;;  %v690_v22 = vmul.f32 1.442695, %v681_v26 }
 0x12f   : >>> { %v716_v59 = vsub.f32 %v1497_v43, %v1742_v0  ;;  %v686_v16 = vsub.f32 0.0, %v678_v36  ;;  %v692_v49 = vmul.f32 1.442695, %v682_v39  ;;  %v717_v44 = vsub.f32 %v1497_v43, %v1330_v1 }
 0x130   : >>> { %v718_v28 = vsub.f32 %v1497_v43, %v1335_v2  ;;  %v687_v24 = vsub.f32 0.0, %v679_v56  ;;  %v694_v20 = vmul.f32 1.442695, %v683_v15  ;;  %v719_v51 = vsub.f32 %v1497_v43, %v1348_v4 }
 0x131   : >>> { %v720_v52 = vsub.f32 %v1497_v43, %v1353_v5  ;;  %v1075_v55 = vpop.eup %1074  ;;  %1090 = vpow2.f32 %v688_v61  ;;  %v696_v12 = vmul.f32 1.442695, %v684_v17  ;;  %v721_v33 = vsub.f32 %v1497_v43, %v1358_v6 }
 0x132   : >>> { %v722_v42 = vsub.f32 %v1497_v43, %v1365_v8  ;;  %v1077_v54 = vpop.eup %1076  ;;  %1092 = vpow2.f32 %v690_v22  ;;  %v698_v57 = vmul.f32 1.442695, %v685_v23  ;;  %v723_v62 = vsub.f32 %v1497_v43, %v1370_v9 }
 0x133   : >>> { %v724_v50 = vmul.f32 %v716_v59, %v716_v59  ;;  %v1079_v63 = vpop.eup %1078  ;;  %1094 = vpow2.f32 %v692_v49  ;;  %v700_v18 = vmul.f32 1.442695, %v686_v16  ;;  %v725_v21 = vmul.f32 %v717_v44, %v717_v44 }
 0x134   : >>> { %v726_v25 = vmul.f32 %v718_v28, %v718_v28  ;;  %v1081_v60 = vpop.eup %1080  ;;  %1096 = vpow2.f32 %v694_v20  ;;  %v702_v35 = vmul.f32 1.442695, %v687_v24  ;;  %v727_v26 = vmul.f32 %v719_v51, %v719_v51 }
 0x135   : >>> { %v728_v36 = vmul.f32 %v720_v52, %v720_v52  ;;  %v1083_v39 = vpop.eup %1082  ;;  %1098 = vpow2.f32 %v696_v12  ;;  %v729_v56 = vmul.f32 %v721_v33, %v721_v33  ;;  %v730_v15 = vmul.f32 %v722_v42, %v722_v42 }
 0x136   : >>> { %v731_v17 = vmul.f32 %v723_v62, %v723_v62  ;;  %v1085_v61 = vpop.eup %1084  ;;  %v732_v23 = vsub.f32 0.0, %v724_v50  ;;  %v733_v22 = vsub.f32 0.0, %v725_v21  ;;  %v734_v43 = vsub.f32 0.0, %v726_v25 }
 0x137   : >>> { %v735_v59 = vsub.f32 0.0, %v727_v26  ;;  %v1087_v0 = vpop.eup %1086  ;;  %1100 = vpow2.f32 %v698_v57  ;;  %v736_v16 = vsub.f32 0.0, %v728_v36  ;;  %v737_v49 = vsub.f32 0.0, %v729_v56 }
 0x138   : >>> { %v738_v44 = vsub.f32 0.0, %v730_v15  ;;  %v1089_v28 = vpop.eup %1088  ;;  %1102 = vpow2.f32 %v700_v18  ;;  %v740_v24 = vmul.f32 1.442695, %v732_v23  ;;  %v742_v20 = vmul.f32 1.442695, %v733_v22 }
 0x139   : >>> { %v744_v51 = vmul.f32 1.442695, %v734_v43  ;;  %v600_v52 = vadd.f32 %v1595_v34, %v1560_v53  ;;  %1104 = vpow2.f32 %v702_v35  ;;  %v739_v12 = vsub.f32 0.0, %v731_v17 }
 0x13a   : >>> { %v746_v33 = vmul.f32 1.442695, %v735_v59  ;;  %v553_v42 = vadd.f32 %v1577_v27, %v1544_v31  ;;  %v601_v57 = vadd.f32 %v1599_v58, %v1575_v19  ;;  %1106 = vpow2.f32 %v740_v24 }
 0x13b   : >>> { %v748_v62 = vmul.f32 1.442695, %v736_v16  ;;  %v1091_v50 = vpop.eup %1090  ;;  %v554_v18 = vadd.f32 %v1579_v41, %v1546_v30  ;;  %v602_v21 = vadd.f32 %v1603_v3, %v1611_v38  ;;  %1108 = vpow2.f32 %v742_v20 }
 0x13c   : >>> { %v750_v53 = vmul.f32 1.442695, %v737_v49  ;;  %v1093_v34 = vpop.eup %1092  ;;  %v555_v25 = vadd.f32 %v1583_v45, %v1548_v32  ;;  %v603_v31 = vadd.f32 %v1605_v29, %v1617_v7  ;;  %1110 = vpow2.f32 %v744_v51 }
 0x13d   : >>> { %v752_v19 = vmul.f32 1.442695, %v738_v44  ;;  %v1095_v27 = vpop.eup %1094  ;;  %v604_v58 = vadd.f32 %v1607_v37, %v1623_v48  ;;  %v652_v35 = vadd.f32 %v1075_v55, %v600_v52  ;;  %1112 = vpow2.f32 %v746_v33 }
 0x13e   : >>> { %v754_v30 = vmul.f32 1.442695, %v739_v12  ;;  %v1097_v41 = vpop.eup %1096  ;;  %v605_v3 = vadd.f32 %v1613_v40, %v553_v42  ;;  %v653_v38 = vadd.f32 %v1077_v54, %v601_v57  ;;  %1114 = vpow2.f32 %v748_v62 }
 0x13f   : >>> { %v1099_v26 = vpop.eup %1098  ;;  %v606_v32 = vadd.f32 %v1619_v46, %v554_v18  ;;  %v654_v45 = vadd.f32 %v1079_v63, %v602_v21  ;;  %1116 = vpow2.f32 %v750_v53  ;;  %v607_v29 = vadd.f32 %v1625_v47, %v555_v25 }
 0x140   : >>> { %v655_v7 = vadd.f32 %v1081_v60, %v603_v31  ;;  %1118 = vpow2.f32 %v752_v19  ;;  %v656_v56 = vadd.f32 %v1083_v39, %v604_v58  ;;  %v704_v37 = vadd.f32 %v1091_v50, %v652_v35 }
 0x141   : >>> { %v1101_v36 = vpop.eup %1100  ;;  %1120 = vpow2.f32 %v754_v30  ;;  %v657_v55 = vadd.f32 %v1085_v61, %v605_v3  ;;  %v705_v15 = vadd.f32 %v1093_v34, %v653_v38  ;;  %v658_v40 = vadd.f32 %v1087_v0, %v606_v32 }
 0x142   : >>> { %v1103_v48 = vpop.eup %1102  ;;  %v706_v54 = vadd.f32 %v1095_v27, %v654_v45  ;;  %v659_v22 = vadd.f32 %v1089_v28, %v607_v29  ;;  %v707_v43 = vadd.f32 %v1097_v41, %v655_v7  ;;  %v708_v63 = vadd.f32 %v1099_v26, %v656_v56 }
 0x143   : >>> { %v1105_v17 = vpop.eup %1104  ;;  %v709_v47 = vadd.f32 %v1101_v36, %v657_v55  ;;  %v710_v44 = vadd.f32 %v1103_v48, %v658_v40 }
 0x144   : >>> { %v1107_v23 = vpop.eup %1106  ;;  %v711_v20 = vadd.f32 %v1105_v17, %v659_v22 }
 0x145   : >>> { %v1109_v46 = vpop.eup %1108  ;;  %v756_v59 = vadd.f32 %v1107_v23, %v704_v37 }
 0x146   : >>> { %v1111_v16 = vpop.eup %1110  ;;  %v757_v60 = vadd.f32 %v1109_v46, %v705_v15 }
 0x147   : >>> { %v1113_v49 = vpop.eup %1112  ;;  %v758_v39 = vadd.f32 %v1111_v16, %v706_v54  ;;  %764 = vst [vmem:[#allocation2] sm:$0xff] %v756_v59 }
 0x148   : >>> { %v1115_v24 = vpop.eup %1114  ;;  %v759_v61 = vadd.f32 %v1113_v49, %v707_v43  ;;  %765 = vst [vmem:[#allocation2 + $0x8] sm:$0xff] %v757_v60  ;;  %258 = sbr.rel (!%p256_p10) target bundleno = 56 (0x38), region = 92 }
 0x149   : >>> { %v1117_v51 = vpop.eup %1116  ;;  %v760_v0 = vadd.f32 %v1115_v24, %v708_v63  ;;  %766 = vst [vmem:[#allocation2 + $0x10] sm:$0xff] %v758_v39 }
 0x14a   : >>> { %v1119_v52 = vpop.eup %1118  ;;  %v761_v28 = vadd.f32 %v1117_v51, %v709_v47  ;;  %767 = vst [vmem:[#allocation2 + $0x18] sm:$0xff] %v759_v61 }
 0x14b   : >>> { %v1121_v12 = vpop.eup %1120  ;;  %v762_v33 = vadd.f32 %v1119_v52, %v710_v44  ;;  %768 = vst [vmem:[#allocation2 + $0x20] sm:$0xff] %v760_v0 }
 0x14c   : >>> { %v763_v42 = vadd.f32 %v1121_v12, %v711_v20  ;;  %769 = vst [vmem:[#allocation2 + $0x28] sm:$0xff] %v761_v28 }
 0x14d   : >>> { %770 = vst [vmem:[#allocation2 + $0x30] sm:$0xff] %v762_v33 }
 0x14e   : >>> { %771 = vst [vmem:[#allocation2 + $0x38] sm:$0xff] %v763_v42 }
 0x14f   : > { %245 = sbr.rel (!%p243_p11) target bundleno = 51 (0x33), region = 103  ;;  %v772_v57 = vld [vmem:[#allocation2] sm:$0xff] (%p243_p11)  ;;  %v773_v62 = vld [vmem:[#allocation2 + $0x8] sm:$0xff] (%p243_p11)  ;;  %s915_s28 = sshll.u32 (%p243_p11), %s1275_s19, 10 }
 0x150   : > { %v774_v50 = vld [vmem:[#allocation2 + $0x10] sm:$0xff] (%p243_p11)  ;;  %780 = vst [vmem:[%s1399_s12] sm:$0xff] (%p243_p11), %v772_v57  ;;  %781 = vst [vmem:[%s1399_s12 + $0x8] sm:$0xff] (%p243_p11), %v773_v62  ;;  %s1675_s13 = scalar_lea.hbm (%p243_p11), %s1732_s4, %s915_s28  ;;  %s802_s14 = sshll.u32 (%p243_p11), %s1399_s12, 4  ;;  %s1681_s14 = int_to_ptr.vmem [resolvable:$true] %s802_s14 }
 0x151   : > { %782 = vst [vmem:[%s1399_s12 + $0x10] sm:$0xff] (%p243_p11), %v774_v50  ;;  %v775_v13 = vld [vmem:[#allocation2 + $0x18] sm:$0xff] (%p243_p11)  ;;  %s1743_s19 = sand.u32 (%p243_p11), 1, %s1203_s16   ;;  %s1137_s30 = scalar_lea.vmem (%p243_p11), %s1681_s14, 1024 }
 0x152   : > { %v776_v1 = vld [vmem:[#allocation2 + $0x20] sm:$0xff] (%p243_p11)  ;;  %783 = vst [vmem:[%s1399_s12 + $0x18] sm:$0xff] (%p243_p11), %v775_v13  ;;  %s1687_s27 = scalar_lea.sflag (%p243_p11), [#allocation4], %s1743_s19  ;;  %p1138_p12 = scmp.ne.s32.totalorder (%p243_p11), %s1681_s14, %s1137_s30 }
 0x153   : > { %v777_v2 = vld [vmem:[#allocation2 + $0x28] sm:$0xff] (%p243_p11)  ;;  %784 = vst [vmem:[%s1399_s12 + $0x20] sm:$0xff] (%p243_p11), %v776_v1  ;;  %s1226_s5 = smov (%p243_p11), [#allocation6]  }
 0x154   : > { %785 = vst [vmem:[%s1399_s12 + $0x28] sm:$0xff] (%p243_p11), %v777_v2  ;;  %v778_v4 = vld [vmem:[#allocation2 + $0x30] sm:$0xff] (%p243_p11)  ;;  %p1139_p13 = pnand (%p243_p11), %p1138_p12, %p1292_p5  ;;  %s1141_s9 = sshll.u32 (%p243_p11), %s1226_s5, 4  ;;  %s1142_s9 = int_to_ptr.vmem [resolvable:$false] %s1141_s9 }
 0x155   : > { %v779_v5 = vld [vmem:[#allocation2 + $0x38] sm:$0xff] (%p243_p11)  ;;  %786 = vst [vmem:[%s1399_s12 + $0x30] sm:$0xff] (%p243_p11), %v778_v4  ;;  %s1143_s22 = scalar_lea.vmem (%p243_p11), %s1142_s9, 2048  ;;  %p1144_p1 = scmp.lt.s32.totalorder (%p243_p11), %s1681_s14, %s1142_s9 }
 0x156   : > { %787 = vst [vmem:[%s1399_s12 + $0x38] sm:$0xff] %v779_v5  ;;  %p1140_p0 = pneg %p1139_p13  ;;  %p1145_p2 = scmp.lt.s32.totalorder %s1143_s22, %s1137_s30 }
 0x158   : > { %p1146_p3 = por %p1145_p2, %p1144_p1 }
 0x15a   : > { %p1147_p4 = pnand %p1146_p3, %p1140_p0 }
 0x15c   : > { %1150 = shalt.err (!%p1147_p4)
}
 0x15d   : > { %s1151_s10 = scalar_lea.hbm %s1675_s13, 1024  ;;  %s1155_s29 = scalar_lea.hbm %s1732_s4, 2048 }
 0x15e   : > { %p1152_p7 = scmp.ne.s32.totalorder %s1675_s13, %s1151_s10  ;;  %p1156_p10 = scmp.lt.u32.totalorder %s1675_s13, %s1732_s4 }
 0x15f   : > { %p1157_p11 = scmp.lt.u32.totalorder %s1155_s29, %s1151_s10  ;;  %p1159_p13 = scmp.lt.u32.totalorder %s1151_s10, %s1675_s13 }
 0x160   : > { %p1153_p8 = pnand %p1152_p7, %p1292_p5 }
 0x161   : > { %p1158_p12 = por %p1157_p11, %p1156_p10 }
 0x162   : > { %p1154_p9 = pneg %p1153_p8 }
 0x163   : > { %p1160_p0 = por %p1159_p13, %p1158_p12 }
 0x165   : > { %p1161_p1 = pnand %p1160_p0, %p1154_p9 }
 0x167   : > { %1164 = shalt.err (!%p1161_p1)
}
 0x168   : > { %s1227_s8 = smov 128   ;;  %s1228_s23 = smov 8  }
 0x169   : > { %920 = dma.vmem_to_hbm [thread:$0]  (%p1292_p5), %s1681_s14, 1024, %s1675_s13, %s1687_s27, %s1227_s8, %s1227_s8, %s1228_s23  }
 0x16a PF: > { %p932_p2 = scmp.ge.s32.totalorder %s1211_s18, 2  ;;  %s817_s28 = sand.u32 1, %s1199_s15  }
 0x16b   : > { %s818_s7 = scalar_lea.sflag [#allocation4], %s817_s28 }
 0x16c   : > { %p927_p3 = pnand %p932_p2, %p1296_p6 }
 0x16e   : > { %1194 = dma.done.wait (!%p927_p3), %s818_s7, 1024  }
 0x16f   : > { %1196 = vsyncadd (!%p927_p3), %s818_s7, 4294966272  ;;  %p15_p4 = scmp.ge.s32.totalorder %s1279_s21, 4   ;;  %s1744_s15 = smov %s1203_s16 }
 0x170   : > { %s1745_s16 = smov %s1207_s17  ;;  %s1746_s17 = smov %s1290_s24 }
 0x171   : > { %s1747_s18 = smov %s1279_s21  ;;  %17 = sbr.rel (!%p15_p4) target bundleno = 6 (0x6), region = 114 }
 0x178   :  { %823 = vsyncpa [#allocation4], 1 }
 0x179   :  { %825 = vsyncpa [#allocation4 + $0x1], 1 }
 0x17a   :  { %826 = vsyncpa [#allocation5], 1 }
 0x17b   :  { %828 = vsyncpa [#allocation5 + $0x1], 1 }

</bundles_post_ra>
